<compile_context>
chip_gen: v7x
topology: tpu7x:2x2x1
jax: 0.10.0
libtpu: 0.0.40
codegen_flags: <defaults>
</compile_context>

<pallas_src>
import functools

import jax
import jax.numpy as jnp
from jax.experimental import pallas as pl
from jax.experimental.pallas import tpu as pltpu

_LANE = 128
_TARGET_BLOCK_BYTES = 2 * 1024 * 1024   # ~2 MiB blocks: measured HBM roofline knee


def _round_up(n, m):
    return ((n + m - 1) // m) * m


def _vmem_budget_bytes():
    """Usable VMEM budget per core, with headroom for compiler scratch."""
    try:
        cap = pltpu.get_tpu_info().vmem_capacity_bytes
    except Exception:
        kind = ""
        try:
            kind = jax.devices()[0].device_kind.lower()
        except Exception:
            pass
        if "v7" in kind:
            cap = 64 * 1024 * 1024            # v7x: 64 MiB per TensorCore
        elif any(v in kind for v in ("v4", "v5", "v6")):
            cap = 128 * 1024 * 1024           # v4/v5e/v6e: 128 MiB
        else:
            cap = 64 * 1024 * 1024            # unknown: conservative
    return int((cap * 3) // 4)


def _dual_tensorcore():
    """True on chips with 2 TensorCores (v7x) where small parallel grids hurt."""
    try:
        return "v7" in jax.devices()[0].device_kind.lower()
    except Exception:
        return False


# --------------------------------------------------------------------------------------
# fully-resident path: one grid step processes a block of batch elements end to end
# --------------------------------------------------------------------------------------
def _se_resident_kernel(x_ref, w1t_ref, w2_ref, o_ref, *, inv_hw):
    # squeeze: per-batch global average pool over the lane (spatial) axis
    y = jnp.sum(x_ref[...], axis=-1, keepdims=True) * inv_hw                 # [Bb, C, 1]
    # fc1 (C -> Cr, no bias): broadcast-mul + sublane reduce, then ReLU
    h = jnp.maximum(
        jnp.sum(w1t_ref[...][None] * y, axis=1, keepdims=True), 0.0)         # [Bb, 1, Cr]
    # fc2 (Cr -> C, no bias): broadcast-mul + lane reduce, then sigmoid
    s = jax.nn.sigmoid(
        jnp.sum(w2_ref[...][None] * h, axis=-1, keepdims=True))              # [Bb, C, 1]
    # excite: re-read the slab from VMEM (bounds vreg pressure) and scale
    o_ref[...] = x_ref[...] * s


# --------------------------------------------------------------------------------------
# HW-tiled fallback: pass 1 = pool + gate (ragged tail masked), pass 2 = scale
# --------------------------------------------------------------------------------------
def _se_pool_kernel(x_ref, w1t_ref, w2_ref, s_ref, acc_ref, *, inv_hw, hw, tile):
    j = pl.program_id(1)

    @pl.when(j == 0)
    def _():
        acc_ref[...] = jnp.zeros_like(acc_ref)

    x = x_ref[0]                                                             # [C, tile]
    # mask the ragged last tile: lanes >= true HW are out-of-bounds garbage
    lane = jax.lax.broadcasted_iota(jnp.int32, x.shape, 1) + j * tile
    x = jnp.where(lane < hw, x, 0.0)
    acc_ref[...] += jnp.sum(x, axis=-1, keepdims=True)                       # [C, 1]

    @pl.when(j == pl.num_programs(1) - 1)
    def _():
        y = acc_ref[...] * inv_hw                                            # [C, 1]
        h = jnp.maximum(jnp.sum(w1t_ref[...] * y, axis=0, keepdims=True), 0.0)
        s_ref[0] = jax.nn.sigmoid(jnp.sum(w2_ref[...] * h, axis=-1, keepdims=True))


def _se_scale_kernel(s_ref, x_ref, o_ref):
    # ragged-tail writes are masked by Pallas; garbage input lanes never land
    o_ref[0] = x_ref[0] * s_ref[0]                                           # [C, tile]


# --------------------------------------------------------------------------------------
# wrapper
# --------------------------------------------------------------------------------------
@jax.jit
def se_layer(x, w1, w2):
    """SELayer forward.

    x:  [B, C, H, W] float32 (NCHW, like the PyTorch module)
    w1: [Cr, C]  fc[0].weight  (nn.Linear(C, C//r, bias=False))
    w2: [C, Cr]  fc[2].weight  (nn.Linear(C//r, C, bias=False))
    """
    B, C, H, W = x.shape
    Cr = w1.shape[0]
    HW = H * W
    inv_hw = 1.0 / float(HW)

    budget = _vmem_budget_bytes()
    slab = 4 * C * HW                       # one batch element's [C, HW] slab (f32)
    w_bytes = 2 * 4 * C * Cr

    w1t = jnp.transpose(w1)                 # [C, Cr]
    x3 = x.reshape(B, C, HW)                # bitcast-free reshape, no padding

    cost = pl.CostEstimate(
        flops=2 * B * C * HW + 4 * B * C * Cr,
        transcendentals=B * (C + Cr),
        bytes_accessed=2 * B * C * HW * 4 + 2 * C * Cr * 4,
    )

    # batch block: big enough to amortize per-step overhead (~2 MiB blocks), small
    # enough for VMEM; on dual-TC chips keep >= 2 grid steps so both cores get work.
    bblk = max(1, min(B, _TARGET_BLOCK_BYTES // max(slab, 1)))
    if _dual_tensorcore() and B >= 2:
        bblk = min(bblk, pl.cdiv(B, 2))
    while bblk > 1 and 4 * bblk * slab + 2 * w_bytes > budget:
        bblk -= 1

    db_bytes = 4 * bblk * slab + 2 * w_bytes        # double-buffered x + out blocks
    sb_bytes = 2 * slab + 2 * w_bytes               # single-buffered, bblk = 1

    if db_bytes <= budget or sb_bytes <= budget:
        # ---- fused single pass: read x once, write out once (2x HBM traffic) ----
        if db_bytes <= budget:
            pipeline_mode = None                     # default double-buffering
        else:
            bblk = 1                                 # single-buffered regime (v7x mid-size)
            pipeline_mode = pl.Buffered(1)

        def _xspec():
            if pipeline_mode is None:
                return pl.BlockSpec((bblk, C, HW), lambda b: (b, 0, 0))
            return pl.BlockSpec((bblk, C, HW), lambda b: (b, 0, 0),
                                pipeline_mode=pipeline_mode)

        out = pl.pallas_call(
            functools.partial(_se_resident_kernel, inv_hw=inv_hw),
            out_shape=jax.ShapeDtypeStruct((B, C, HW), x.dtype),
            grid=(pl.cdiv(B, bblk),),
            in_specs=[
                _xspec(),                                        # x
                pl.BlockSpec((C, Cr), lambda b: (0, 0)),         # fc1 weight^T
                pl.BlockSpec((C, Cr), lambda b: (0, 0)),         # fc2 weight
            ],
            out_specs=_xspec(),
            compiler_params=pltpu.CompilerParams(
                dimension_semantics=("parallel",),
                vmem_limit_bytes=budget,
            ),
            cost_estimate=cost,
        )(x3, w1t, w2)
    else:
        # ---- HW-tiled fallback (3x traffic): pool+gate, then scale ----
        # lane-dense tile, capped at ~2 MiB (roofline saturates there) and at the
        # budget for double-buffered x + out blocks; at least 128 lanes.
        tile_cap_budget = (budget // (16 * C)) // _LANE * _LANE
        tile_cap_target = (_TARGET_BLOCK_BYTES // (4 * C)) // _LANE * _LANE
        tile = max(_LANE, min(tile_cap_budget, tile_cap_target))
        tile = min(tile, _round_up(HW, _LANE))
        n_hw = pl.cdiv(HW, tile)

        # pass 1: accumulate spatial sum per batch, emit the [C, 1] sigmoid gate
        gate = pl.pallas_call(
            functools.partial(_se_pool_kernel, inv_hw=inv_hw, hw=HW, tile=tile),
            out_shape=jax.ShapeDtypeStruct((B, C, 1), jnp.float32),
            grid=(B, n_hw),
            in_specs=[
                pl.BlockSpec((1, C, tile), lambda b, j: (b, 0, j)),
                pl.BlockSpec((C, Cr), lambda b, j: (0, 0)),
                pl.BlockSpec((C, Cr), lambda b, j: (0, 0)),
            ],
            out_specs=pl.BlockSpec((1, C, 1), lambda b, j: (b, 0, 0)),
            scratch_shapes=[pltpu.VMEM((C, 1), jnp.float32)],
            compiler_params=pltpu.CompilerParams(
                dimension_semantics=("parallel", "arbitrary"),
                vmem_limit_bytes=budget,
            ),
            cost_estimate=pl.CostEstimate(
                flops=B * C * HW, transcendentals=B * (C + Cr),
                bytes_accessed=B * C * HW * 4),
        )(x3, w1t, w2)

        # pass 2: re-read x tiles and write x * gate.  Both axes 'parallel' so both
        # v7x TensorCores stay busy even when B is small.
        out = pl.pallas_call(
            _se_scale_kernel,
            out_shape=jax.ShapeDtypeStruct((B, C, HW), x.dtype),
            grid=(B, n_hw),
            in_specs=[
                pl.BlockSpec((1, C, 1), lambda b, j: (b, 0, 0)),     # gate
                pl.BlockSpec((1, C, tile), lambda b, j: (b, 0, j)),  # x
            ],
            out_specs=pl.BlockSpec((1, C, tile), lambda b, j: (b, 0, j)),
            compiler_params=pltpu.CompilerParams(
                dimension_semantics=("parallel", "parallel"),
                vmem_limit_bytes=budget,
            ),
            cost_estimate=pl.CostEstimate(
                flops=B * C * HW, transcendentals=0,
                bytes_accessed=2 * B * C * HW * 4),
        )(gate, x3)

    return out.reshape(B, C, H, W)


if __name__ == "__main__":
    # SELayer(channel=32, reduction=8)  ->  bottleneck width Cr = 4
    B, C, H, W = 2, 32, 16, 16
    reduction = 8
    Cr = C // reduction

    key = jax.random.PRNGKey(0)
    kx, k1, k2 = jax.random.split(key, 3)
    x = jax.random.normal(kx, (B, C, H, W), jnp.float32)
    w1 = jax.random.normal(k1, (Cr, C), jnp.float32) / jnp.sqrt(C)    # fc[0].weight
    w2 = jax.random.normal(k2, (C, Cr), jnp.float32) / jnp.sqrt(Cr)   # fc[2].weight

    out = se_layer(x, w1, w2)
    jax.block_until_ready(out)

    # pure-JAX reference matching the PyTorch forward
    y = x.mean(axis=(2, 3))                        # [B, C]
    h = jnp.maximum(y @ w1.T, 0.0)                 # [B, Cr]
    s = jax.nn.sigmoid(h @ w2.T)                   # [B, C]
    ref = x * s[:, :, None, None]

    max_err = float(jnp.max(jnp.abs(out - ref)))
    assert jnp.allclose(out, ref, atol=1e-4, rtol=1e-4), f"max abs err = {max_err}"

    print("KERNEL_OK")
</pallas_src>

<mosaic_0001>
module attributes {stable_mosaic.version = 11 : i64} {
  func.func @_se_resident_kernel(%arg0: i32, %arg1: memref<2x32x256xf32, #tpu.memory_space<vmem>>, %arg2: memref<32x4xf32, #tpu.memory_space<vmem>>, %arg3: memref<32x4xf32, #tpu.memory_space<vmem>>, %arg4: memref<2x32x256xf32, #tpu.memory_space<vmem>>) attributes {dimension_semantics = [#tpu.dimension_semantics<parallel>], iteration_bounds = array<i64: 1>, scalar_prefetch = 0 : i64, scratch_operands = 0 : i64, tpu.core_type = #tpu.core_type<tc>, window_params = [{transform_indices = @transform_0, window_bounds = array<i64: 2, 32, 256>}, {pipeline_mode = #tpu.pipeline_mode<synchronous>, transform_indices = @transform_1, window_bounds = array<i64: 32, 4>}, {pipeline_mode = #tpu.pipeline_mode<synchronous>, transform_indices = @transform_2, window_bounds = array<i64: 32, 4>}, {transform_indices = @transform_3, window_bounds = array<i64: 2, 32, 256>}]} {
    %c0 = arith.constant 0 : index
    %c0_0 = arith.constant 0 : index
    %c0_1 = arith.constant 0 : index
    %0 = vector.load %arg1[%c0, %c0_0, %c0_1] : memref<2x32x256xf32, #tpu.memory_space<vmem>>, vector<2x32x256xf32>
    %cst = arith.constant dense<0.000000e+00> : vector<2x32xf32>
    %1 = vector.multi_reduction <add>, %0, %cst [2] : vector<2x32x256xf32> to vector<2x32xf32>
    %2 = vector.shape_cast %1 : vector<2x32xf32> to vector<2x32x1xf32>
    %cst_2 = arith.constant 3.906250e-03 : f32
    %3 = vector.broadcast %cst_2 : f32 to vector<2x32x1xf32>
    %4 = arith.mulf %2, %3 : vector<2x32x1xf32>
    %c0_3 = arith.constant 0 : index
    %c0_4 = arith.constant 0 : index
    %5 = vector.load %arg2[%c0_3, %c0_4] : memref<32x4xf32, #tpu.memory_space<vmem>>, vector<32x4xf32>
    %6 = vector.shape_cast %5 : vector<32x4xf32> to vector<1x32x4xf32>
    %7 = vector.broadcast %6 : vector<1x32x4xf32> to vector<2x32x4xf32>
    %8 = vector.broadcast %4 : vector<2x32x1xf32> to vector<2x32x4xf32>
    %9 = arith.mulf %7, %8 : vector<2x32x4xf32>
    %cst_5 = arith.constant dense<0.000000e+00> : vector<2x4xf32>
    %10 = vector.multi_reduction <add>, %9, %cst_5 [1] : vector<2x32x4xf32> to vector<2x4xf32>
    %11 = vector.shape_cast %10 : vector<2x4xf32> to vector<2x1x4xf32>
    %cst_6 = arith.constant 0.000000e+00 : f32
    %12 = vector.broadcast %cst_6 : f32 to vector<2x1x4xf32>
    %13 = arith.maximumf %11, %12 : vector<2x1x4xf32>
    %c0_7 = arith.constant 0 : index
    %c0_8 = arith.constant 0 : index
    %14 = vector.load %arg3[%c0_7, %c0_8] : memref<32x4xf32, #tpu.memory_space<vmem>>, vector<32x4xf32>
    %15 = vector.shape_cast %14 : vector<32x4xf32> to vector<1x32x4xf32>
    %16 = vector.broadcast %15 : vector<1x32x4xf32> to vector<2x32x4xf32>
    %17 = vector.broadcast %13 : vector<2x1x4xf32> to vector<2x32x4xf32>
    %18 = arith.mulf %16, %17 : vector<2x32x4xf32>
    %cst_9 = arith.constant dense<0.000000e+00> : vector<2x32xf32>
    %19 = vector.multi_reduction <add>, %18, %cst_9 [2] : vector<2x32x4xf32> to vector<2x32xf32>
    %20 = vector.shape_cast %19 : vector<2x32xf32> to vector<2x32x1xf32>
    %21 = arith.negf %20 : vector<2x32x1xf32>
    %22 = math.exp %21 : vector<2x32x1xf32>
    %cst_10 = arith.constant 1.000000e+00 : f32
    %23 = vector.broadcast %cst_10 : f32 to vector<2x32x1xf32>
    %24 = arith.addf %23, %22 : vector<2x32x1xf32>
    %25 = arith.divf %23, %24 : vector<2x32x1xf32>
    %c0_11 = arith.constant 0 : index
    %c0_12 = arith.constant 0 : index
    %c0_13 = arith.constant 0 : index
    %26 = vector.load %arg1[%c0_11, %c0_12, %c0_13] : memref<2x32x256xf32, #tpu.memory_space<vmem>>, vector<2x32x256xf32>
    %27 = vector.broadcast %25 : vector<2x32x1xf32> to vector<2x32x256xf32>
    %28 = arith.mulf %26, %27 : vector<2x32x256xf32>
    %c0_14 = arith.constant 0 : index
    %c0_15 = arith.constant 0 : index
    %c0_16 = arith.constant 0 : index
    %29 = vector.load %arg4[%c0_14, %c0_15, %c0_16] : memref<2x32x256xf32, #tpu.memory_space<vmem>>, vector<2x32x256xf32>
    tpu.vector_store %arg4[%c0_14, %c0_15, %c0_16], %28 {strides = array<i32>} : memref<2x32x256xf32, #tpu.memory_space<vmem>>, vector<2x32x256xf32>,
    return
  }
  func.func @transform_0(%arg0: i32) -> (i32, i32, i32) {
    %c0_i32 = arith.constant 0 : i32
    %c0_i32_0 = arith.constant 0 : i32
    %c0_i32_1 = arith.constant 0 : i32
    return %arg0, %c0_i32, %c0_i32_0 : i32, i32, i32
  }
  func.func @transform_1(%arg0: i32) -> (i32, i32) {
    %c0_i32 = arith.constant 0 : i32
    %c0_i32_0 = arith.constant 0 : i32
    %c0_i32_1 = arith.constant 0 : i32
    return %c0_i32, %c0_i32_0 : i32, i32
  }
  func.func @transform_2(%arg0: i32) -> (i32, i32) {
    %c0_i32 = arith.constant 0 : i32
    %c0_i32_0 = arith.constant 0 : i32
    %c0_i32_1 = arith.constant 0 : i32
    return %c0_i32, %c0_i32_0 : i32, i32
  }
  func.func @transform_3(%arg0: i32) -> (i32, i32, i32) {
    %c0_i32 = arith.constant 0 : i32
    %c0_i32_0 = arith.constant 0 : i32
    %c0_i32_1 = arith.constant 0 : i32
    return %arg0, %c0_i32, %c0_i32_0 : i32, i32, i32
  }
}

</mosaic_0001>

<bundles_post_ra>
// kernel: se_layer.1
= control target key start
LH: loop header
LB: loop body
LE: loop exit
PB: predicated region body
PF: predicated region fallthrough
CT: control target
= control target key end

     0   :  { %vm74_vm0 = vcmask 31744   ;;  %s483_s0 = inlined_call_operand.vmem [shape: f32[2,32,256], index: 0, kind: input, shape index: {}]   ;;  %s484_s1 = inlined_call_operand.vmem [shape: f32[32,4], index: 1, kind: input, shape index: {}]   ;;  %s485_s2 = inlined_call_operand.vmem [shape: f32[32,4], index: 2, kind: input, shape index: {}]   ;;  %s486_s3 = inlined_call_operand.vmem [shape: f32[2,32,256], index: 3, kind: output, shape index: {}]  }
   0x1   :  { %v286_v0 = vld [vmem:[%s483_s0 + $0x40] sm:$0xff]  ;;  %v291_v1 = vld [vmem:[%s483_s0 + $0x48] sm:$0xff]  ;;  %v308_v5 = vld [vmem:[%s483_s0 + $0x50] sm:$0xff] }
   0x2   :  { %v296_v2 = vld [vmem:[%s483_s0] sm:$0xff]  ;;  %v42_v3 = vadd.f32 %v291_v1, %v286_v0  ;;  %v303_v4 = vld [vmem:[%s483_s0 + $0x8] sm:$0xff]  ;;  %v313_v6 = vld [vmem:[%s483_s0 + $0x58] sm:$0xff] }
   0x3   :  { %v30_v7 = vadd.f32 %v303_v4, %v296_v2  ;;  %v320_v8 = vld [vmem:[%s483_s0 + $0x10] sm:$0xff]  ;;  %v325_v9 = vld [vmem:[%s483_s0 + $0x18] sm:$0xff]  ;;  %v45_v10 = vadd.f32 %v313_v6, %v308_v5  ;;  %v334_v12 = vld [vmem:[%s483_s0 + $0x60] sm:$0xff] }
   0x4   :  { %43 = vadd.xlane.f32.xlu1 %v42_v3  ;;  %v33_v11 = vadd.f32 %v325_v9, %v320_v8  ;;  %v339_v13 = vld [vmem:[%s483_s0 + $0x68] sm:$0xff]  ;;  %v344_v14 = vld [vmem:[%s483_s0 + $0x20] sm:$0xff]  ;;  %v358_v18 = vld [vmem:[%s483_s0 + $0x70] sm:$0xff] }
   0x5   :  { %31 = vadd.xlane.f32.xlu0 %v30_v7  ;;  %v349_v15 = vld [vmem:[%s483_s0 + $0x28] sm:$0xff]  ;;  %v48_v16 = vadd.f32 %v339_v13, %v334_v12  ;;  %v363_v19 = vld [vmem:[%s483_s0 + $0x78] sm:$0xff]  ;;  %v368_v20 = vld [vmem:[%s483_s0 + $0x30] sm:$0xff] }
   0x6   :  { %v36_v17 = vadd.f32 %v349_v15, %v344_v14  ;;  %v373_v21 = vld [vmem:[%s483_s0 + $0x38] sm:$0xff]  ;;  %v51_v22 = vadd.f32 %v363_v19, %v358_v18  ;;  %v62_v27 = vld [vmem:[%s484_s1] sm:$0xff]  ;;  %v63_v30 = vld [vmem:[%s484_s1 + $0x8] sm:$0xff] }
   0x7   :  { %v39_v23 = vadd.f32 %v373_v21, %v368_v20  ;;  %v64_v40 = vld [vmem:[%s484_s1 + $0x10] sm:$0xff]  ;;  %v65_v49 = vld [vmem:[%s484_s1 + $0x18] sm:$0xff] }
   0x8   :  { %46 = vadd.xlane.f32.xlu1 %v45_v10 }
   0x9   :  { %34 = vadd.xlane.f32.xlu0 %v33_v11 }
   0xc   :  { %49 = vadd.xlane.f32.xlu1 %v48_v16 }
   0xd   :  { %37 = vadd.xlane.f32.xlu0 %v36_v17 }
  0x10   :  { %52 = vadd.xlane.f32.xlu1 %v51_v22 }
  0x11   :  { %40 = vadd.xlane.f32.xlu0 %v39_v23 }
  0x91   :  { %v44_v24 = vpop.xlane.xlu1 %43 }
  0x92   :  { %v58_v25 = vmul.f32 0.00390625, %v44_v24  ;;  %v32_v26 = vpop.xlane.xlu0 %31 }
  0x93   :  { %v54_v33 = vmul.f32 0.00390625, %v32_v26 }
  0x94   :  { %v70_v28 = vmul.f32 %v62_v27, %v58_v25 }
  0x95   :  { %v47_v29 = vpop.xlane.xlu1 %46  ;;  %v66_v43 = vmul.f32 %v62_v27, %v54_v33  ;;  %v106_v33 = vld [vmem:[%s485_s2 + $0x18] sm:$0xff] }
  0x96   :  { %v59_v31 = vmul.f32 0.00390625, %v47_v29  ;;  %v35_v32 = vpop.xlane.xlu0 %34  ;;  %v88_v35 = vsel %vm74_vm0, %v70_v28, 0.0  ;;  %v104_v29 = vld [vmem:[%s485_s2 + $0x8] sm:$0xff] }
  0x97   :  { %v55_v34 = vmul.f32 0.00390625, %v35_v32  ;;  %v75_v54 = vsel %vm74_vm0, %v66_v43, 0.0 }
  0x98   :  { %v71_v36 = vmul.f32 %v63_v30, %v59_v31 }
  0x99   :  { %v67_v37 = vmul.f32 %v63_v30, %v55_v34  ;;  %v50_v38 = vpop.xlane.xlu1 %49  ;;  %v103_v30 = vld [vmem:[%s485_s2] sm:$0xff]  ;;  %v105_v34 = vld [vmem:[%s485_s2 + $0x10] sm:$0xff] }
  0x9a   :  { %v89_v39 = vsel %vm74_vm0, %v71_v36, 0.0  ;;  %v60_v41 = vmul.f32 0.00390625, %v50_v38  ;;  %v38_v42 = vpop.xlane.xlu0 %37 }
  0x9b   :  { %v90_v44 = vadd.f32 %v89_v39, %v88_v35  ;;  %v56_v45 = vmul.f32 0.00390625, %v38_v42  ;;  %v76_v47 = vsel %vm74_vm0, %v67_v37, 0.0 }
  0x9c   :  { %v72_v46 = vmul.f32 %v64_v40, %v60_v41  ;;  %v77_v58 = vadd.f32 %v76_v47, %v75_v54 }
  0x9d   :  { %v68_v48 = vmul.f32 %v64_v40, %v56_v45  ;;  %v53_v50 = vpop.xlane.xlu1 %52 }
  0x9e   :  { %v91_v51 = vsel %vm74_vm0, %v72_v46, 0.0  ;;  %v61_v52 = vmul.f32 0.00390625, %v53_v50  ;;  %v41_v53 = vpop.xlane.xlu0 %40 }
  0x9f   :  { %v92_v55 = vadd.f32 %v91_v51, %v90_v44  ;;  %v78_v56 = vsel %vm74_vm0, %v68_v48, 0.0  ;;  %v57_v57 = vmul.f32 0.00390625, %v41_v53 }
  0xa0   :  { %v73_v59 = vmul.f32 %v65_v49, %v61_v52  ;;  %v79_v61 = vadd.f32 %v78_v56, %v77_v58 }
  0xa1   :  { %v69_v60 = vmul.f32 %v65_v49, %v57_v57 }
  0xa2   :  { %v93_v62 = vsel %vm74_vm0, %v73_v59, 0.0 }
  0xa3   :  { %v94_v63 = vadd.f32 %v93_v62, %v92_v55  ;;  %v80_v3 = vsel %vm74_vm0, %v69_v60, 0.0 }
  0xa4   :  { %v81_v7 = vadd.f32 %v80_v3, %v79_v61 }
  0xa5   :  { %v95_v10 = vrot.slane %v94_v63, 4 }
  0xa6   :  { %v82_v11 = vrot.slane %v81_v7, 4 }
  0xa7   :  { %v96_v16 = vadd.f32 %v95_v10, %v94_v63 }
  0xa8   :  { %v83_v17 = vadd.f32 %v82_v11, %v81_v7 }
  0xa9   :  { %v97_v22 = vrot.slane %v96_v16, 2 }
  0xaa   :  { %v84_v23 = vrot.slane %v83_v17, 2 }
  0xab   :  { %v98_v24 = vadd.f32 %v97_v22, %v96_v16 }
  0xac   :  { %v85_v25 = vadd.f32 %v84_v23, %v83_v17 }
  0xad   :  { %v99_v26 = vrot.slane %v98_v24, 1 }
  0xae   :  { %v86_v27 = vrot.slane %v85_v25, 1 }
  0xaf   :  { %v100_v31 = vadd.f32 %v99_v26, %v98_v24 }
  0xb0   :  { %v87_v28 = vadd.f32 %v86_v27, %v85_v25 }
  0xb1   :  { %v102_v37 = vmax.f32 %v100_v31, 0.0 }
  0xb2   :  { %v101_v32 = vmax.f32 %v87_v28, 0.0 }
  0xb3   :  { %v112_v44 = vmul.f32 %v104_v29, %v102_v37  ;;  %v111_v45 = vmul.f32 %v103_v30, %v102_v37  ;;  %v114_v48 = vmul.f32 %v106_v33, %v102_v37  ;;  %v113_v49 = vmul.f32 %v105_v34, %v102_v37 }
  0xb4   :  { %v108_v35 = vmul.f32 %v104_v29, %v101_v32  ;;  %v107_v36 = vmul.f32 %v103_v30, %v101_v32  ;;  %v110_v40 = vmul.f32 %v106_v33, %v101_v32  ;;  %v109_v41 = vmul.f32 %v105_v34, %v101_v32 }
  0xb5   :  { %v130_v46 = vsel %vm74_vm0, %v112_v44, 0.0  ;;  %v127_v47 = vsel %vm74_vm0, %v111_v45, 0.0  ;;  %v136_v50 = vsel %vm74_vm0, %v114_v48, 0.0  ;;  %v133_v51 = vsel %vm74_vm0, %v113_v49, 0.0 }
  0xb6   :  { %v118_v38 = vsel %vm74_vm0, %v108_v35, 0.0  ;;  %v115_v39 = vsel %vm74_vm0, %v107_v36, 0.0  ;;  %v124_v42 = vsel %vm74_vm0, %v110_v40, 0.0  ;;  %v121_v43 = vsel %vm74_vm0, %v109_v41, 0.0 }
  0xb7   :  { %119 = vadd.xlane.f32.xlu1 %v118_v38  ;;  %116 = vadd.xlane.f32.xlu0 %v115_v39 }
  0xbb   :  { %125 = vadd.xlane.f32.xlu1 %v124_v42  ;;  %122 = vadd.xlane.f32.xlu0 %v121_v43 }
  0xbf   :  { %131 = vadd.xlane.f32.xlu1 %v130_v46  ;;  %128 = vadd.xlane.f32.xlu0 %v127_v47 }
  0xc3   :  { %137 = vadd.xlane.f32.xlu1 %v136_v50  ;;  %134 = vadd.xlane.f32.xlu0 %v133_v51 }
 0x144   :  { %v120_v52 = vpop.xlane.xlu1 %119  ;;  %v117_v53 = vpop.xlane.xlu0 %116 }
 0x145   :  { %v224_v54 = vmul.f32 -1.442695, %v120_v52  ;;  %v223_v55 = vmul.f32 -1.442695, %v117_v53 }
 0x147   :  { %231 = vpow2.f32 %v224_v54 }
 0x148   :  { %233 = vpow2.f32 %v223_v55  ;;  %v126_v56 = vpop.xlane.xlu1 %125  ;;  %v123_v57 = vpop.xlane.xlu0 %122 }
 0x149   :  { %v226_v58 = vmul.f32 -1.442695, %v126_v56  ;;  %v225_v59 = vmul.f32 -1.442695, %v123_v57 }
 0x14b   :  { %235 = vpow2.f32 %v226_v58 }
 0x14c   :  { %237 = vpow2.f32 %v225_v59  ;;  %v132_v60 = vpop.xlane.xlu1 %131  ;;  %v129_v61 = vpop.xlane.xlu0 %128 }
 0x14d   :  { %v228_v62 = vmul.f32 -1.442695, %v132_v60  ;;  %v227_v63 = vmul.f32 -1.442695, %v129_v61 }
 0x14f   :  { %239 = vpow2.f32 %v228_v62 }
 0x150   :  { %241 = vpow2.f32 %v227_v63  ;;  %v138_v3 = vpop.xlane.xlu1 %137  ;;  %v135_v7 = vpop.xlane.xlu0 %134 }
 0x151   :  { %v232_v10 = vpop.eup %231  ;;  %v230_v11 = vmul.f32 -1.442695, %v138_v3  ;;  %v229_v22 = vmul.f32 -1.442695, %v135_v7 }
 0x152   :  { %v234_v16 = vpop.eup %233  ;;  %v164_v17 = vadd.f32 1.0, %v232_v10 }
 0x153   :  { %v163_v23 = vadd.f32 1.0, %v234_v16  ;;  %243 = vpow2.f32 %v230_v11 }
 0x154   :  { %245 = vrcp.f32 %v164_v17 }
 0x155   :  { %v236_v24 = vpop.eup %235  ;;  %247 = vrcp.f32 %v163_v23 }
 0x156   :  { %v238_v25 = vpop.eup %237  ;;  %v166_v26 = vadd.f32 1.0, %v236_v24  ;;  %249 = vpow2.f32 %v229_v22 }
 0x157   :  { %v165_v27 = vadd.f32 1.0, %v238_v25 }
 0x158   :  { %251 = vrcp.f32 %v166_v26 }
 0x159   :  { %v240_v28 = vpop.eup %239  ;;  %253 = vrcp.f32 %v165_v27 }
 0x15a   :  { %v242_v29 = vpop.eup %241  ;;  %v168_v30 = vadd.f32 1.0, %v240_v28 }
 0x15b   :  { %v167_v31 = vadd.f32 1.0, %v242_v29 }
 0x15c   :  { %255 = vrcp.f32 %v168_v30 }
 0x15d   :  { %v244_v32 = vpop.eup %243  ;;  %257 = vrcp.f32 %v167_v31 }
 0x15e   :  { %v246_v33 = vpop.eup %245  ;;  %v170_v34 = vadd.f32 1.0, %v244_v32 }
 0x15f   :  { %v248_v35 = vpop.eup %247  ;;  %v189_v36 = vmul.f32 %v246_v33, %v320_v8  ;;  %v190_v37 = vmul.f32 %v246_v33, %v325_v9 }
 0x160   :  { %v250_v38 = vpop.eup %249  ;;  %v187_v39 = vmul.f32 %v248_v35, %v296_v2  ;;  %v188_v40 = vmul.f32 %v248_v35, %v303_v4  ;;  %259 = vrcp.f32 %v170_v34 }
 0x161   :  { %205 = vst [vmem:[%s486_s3 + $0x10] sm:$0xff] %v189_v36  ;;  %206 = vst [vmem:[%s486_s3 + $0x18] sm:$0xff] %v190_v37  ;;  %v169_v41 = vadd.f32 1.0, %v250_v38 }
 0x162   :  { %v252_v42 = vpop.eup %251  ;;  %203 = vst [vmem:[%s486_s3] sm:$0xff] %v187_v39  ;;  %204 = vst [vmem:[%s486_s3 + $0x8] sm:$0xff] %v188_v40 }
 0x163   :  { %v254_v2 = vpop.eup %253  ;;  %v193_v4 = vmul.f32 %v252_v42, %v368_v20  ;;  %v194_v8 = vmul.f32 %v252_v42, %v373_v21  ;;  %261 = vrcp.f32 %v169_v41 }
 0x164   :  { %v191_v9 = vmul.f32 %v254_v2, %v344_v14  ;;  %v192_v43 = vmul.f32 %v254_v2, %v349_v15 }
 0x165   :  { %209 = vst [vmem:[%s486_s3 + $0x30] sm:$0xff] %v193_v4  ;;  %210 = vst [vmem:[%s486_s3 + $0x38] sm:$0xff] %v194_v8 }
 0x166   :  { %v256_v44 = vpop.eup %255  ;;  %207 = vst [vmem:[%s486_s3 + $0x20] sm:$0xff] %v191_v9  ;;  %208 = vst [vmem:[%s486_s3 + $0x28] sm:$0xff] %v192_v43 }
 0x167   :  { %v258_v14 = vpop.eup %257  ;;  %v197_v15 = vmul.f32 %v256_v44, %v308_v5  ;;  %v198_v20 = vmul.f32 %v256_v44, %v313_v6 }
 0x168   :  { %v195_v21 = vmul.f32 %v258_v14, %v286_v0  ;;  %v196_v45 = vmul.f32 %v258_v14, %v291_v1 }
 0x169   :  { %213 = vst [vmem:[%s486_s3 + $0x50] sm:$0xff] %v197_v15  ;;  %214 = vst [vmem:[%s486_s3 + $0x58] sm:$0xff] %v198_v20 }
 0x16a   :  { %v260_v46 = vpop.eup %259  ;;  %211 = vst [vmem:[%s486_s3 + $0x40] sm:$0xff] %v195_v21  ;;  %212 = vst [vmem:[%s486_s3 + $0x48] sm:$0xff] %v196_v45 }
 0x16b   :  { %v201_v0 = vmul.f32 %v260_v46, %v358_v18  ;;  %v202_v1 = vmul.f32 %v260_v46, %v363_v19 }
 0x16d   :  { %v262_v5 = vpop.eup %261  ;;  %217 = vst [vmem:[%s486_s3 + $0x70] sm:$0xff] %v201_v0  ;;  %218 = vst [vmem:[%s486_s3 + $0x78] sm:$0xff] %v202_v1 }
 0x16e   :  { %v199_v6 = vmul.f32 %v262_v5, %v334_v12  ;;  %v200_v47 = vmul.f32 %v262_v5, %v339_v13 }
 0x170   :  { %215 = vst [vmem:[%s486_s3 + $0x60] sm:$0xff] %v199_v6  ;;  %216 = vst [vmem:[%s486_s3 + $0x68] sm:$0xff] %v200_v47 }

</bundles_post_ra>
